<compile_context>
chip_gen: v5e
topology: v5e:2x2
jax: 0.10.0
libtpu: 0.0.40
codegen_flags: <defaults>
</compile_context>

<pallas_src>
import jax
import jax.numpy as jnp
from jax.experimental import pallas as pl
from jax.experimental.pallas import tpu as pltpu


def _cdiv(a, b):
    return -(-a // b)


def _group_sizes(num_channels, num_groups):
    """Static (compile-time) group sizes, matching torch `group_sizes`."""
    base = num_channels // num_groups
    rem = num_channels - base * num_groups
    return [base + (1 if i < rem else 0) for i in range(num_groups)]


# ---------------------------------------------------------------------------
# Fused Pallas kernel:
#   out = x_pool * expand_group_feat(tanh(relu(comp_max * w + b)), G, F)
# ---------------------------------------------------------------------------
def _make_fused_gate_kernel(num_groups, num_channels):
    G, F = num_groups, num_channels
    use_matmul = (G > 1) and (G < F)

    def kernel(xp_ref, cm_ref, w_ref, b_ref, m_ref, o_ref):
        # f32 math on all generations; I/O dtype is whatever the wrapper chose.
        cm = cm_ref[...].astype(jnp.float32)                       # (rows, G)
        w = w_ref[...].astype(jnp.float32)                         # (1, G)
        b = b_ref[...].astype(jnp.float32)                         # (1, G)
        # Gating: G tanh per row (EUP work amortized across F output channels).
        gate = jnp.tanh(jnp.maximum(cm * w + b, 0.0))              # (rows, G)
        if use_matmul:
            # Per-group expansion as an MXU matmul against the static 0/1
            # membership matrix: no XLU reshape, no gather, lane-dense result.
            gate = jnp.dot(gate, m_ref[...],
                           preferred_element_type=jnp.float32)     # (rows, F)
        # else: G == 1 broadcasts naturally; G >= F needs no expansion.
        xp = xp_ref[...].astype(jnp.float32)                       # (rows, F)
        o_ref[...] = (xp * gate).astype(o_ref.dtype)

    return kernel


def _pick_block_rows(n_rows, row_bytes, target_bytes, sublane=16):
    """~target_bytes blocks; >=2 grid steps when possible (v7x megacore);
    sublane-multiple rows (bf16-safe) or the full extent for tiny inputs."""
    if n_rows < 2 * sublane:
        return n_rows                               # single full block
    br = max(sublane, int(target_bytes) // max(int(row_bytes), 1))
    br = min(br, _cdiv(n_rows, 2))                  # >=2 blocks -> both v7x TCs
    br = max(sublane, (br // sublane) * sublane)
    return br


def gated_pool_scale(x_pool, comp_max, weight, bias, *, num_groups,
                     out_dtype=None, target_block_bytes=2 << 20):
    """Fused `x_pool * expand_group_feat(Gating(comp_max), G, F)`.

    x_pool: (N, F); comp_max: (N, G); weight, bias: (1, G). Returns (N, F).
    """
    N, F = x_pool.shape
    G = int(num_groups)
    assert comp_max.shape == (N, G)
    out_dtype = x_pool.dtype if out_dtype is None else out_dtype

    w = weight.reshape(1, G).astype(jnp.float32)
    b = bias.reshape(1, G).astype(jnp.float32)

    # Static 0/1 group-membership matrix (G, F): member[g, c] = 1 iff channel c
    # belongs to group g (only read by the kernel when 1 < G < F).
    sizes = _group_sizes(F, G)
    cols = []
    for g, s in enumerate(sizes):
        cols.extend([g] * s)
    member = (jnp.asarray(cols, jnp.int32)[None, :] ==
              jnp.arange(G, dtype=jnp.int32)[:, None]).astype(jnp.float32)

    row_bytes = F * jnp.dtype(x_pool.dtype).itemsize
    block_rows = _pick_block_rows(N, row_bytes, target_block_bytes)
    grid = (pl.cdiv(N, block_rows),)   # ragged last block is masked by Pallas

    kernel = _make_fused_gate_kernel(G, F)
    return pl.pallas_call(
        kernel,
        out_shape=jax.ShapeDtypeStruct((N, F), out_dtype),
        grid=grid,
        in_specs=[
            pl.BlockSpec((block_rows, F), lambda i: (i, 0)),   # x_pool tile
            pl.BlockSpec((block_rows, G), lambda i: (i, 0)),   # comp_max tile
            pl.BlockSpec((1, G), lambda i: (0, 0)),            # weight (resident)
            pl.BlockSpec((1, G), lambda i: (0, 0)),            # bias (resident)
            pl.BlockSpec((G, F), lambda i: (0, 0)),            # membership (resident)
        ],
        out_specs=pl.BlockSpec((block_rows, F), lambda i: (i, 0)),
        compiler_params=pltpu.CompilerParams(
            # Independent per row-block -> shards across v7x's 2 TensorCores.
            dimension_semantics=("parallel",),
        ),
    )(x_pool, comp_max, w, b, member)


# ---------------------------------------------------------------------------
# GroupBimodalCSRPool post-encoder core (CSR attention pooling + fused gating)
# ---------------------------------------------------------------------------
def _expand_group_feat(A, num_groups, num_channels):
    """expand_group_feat with static group sizes: reshape/broadcast when the
    channels split evenly, static per-group broadcast+concat otherwise.
    (No dynamic jnp.repeat gather over the big tensors.)"""
    if num_groups == 1:
        return A.reshape(-1, 1)
    if num_groups >= num_channels:
        return A
    sizes = _group_sizes(num_channels, num_groups)
    n = A.shape[0]
    if len(set(sizes)) == 1:
        k = sizes[0]
        return jnp.broadcast_to(A[:, :, None], (n, num_groups, k)).reshape(n, num_channels)
    parts = [jnp.broadcast_to(A[:, g:g + 1], (n, s)) for g, s in enumerate(sizes)]
    return jnp.concatenate(parts, axis=1)


def _segment_softmax_csr(src, csr_idx, num_segments, eps=1e-12, scaling=False):
    """segment_softmax_csr (scaled CSR softmax) in JAX; also returns the
    per-segment max (needed for the gating branch) and dense segment ids."""
    V = src.shape[0]
    lengths = csr_idx[1:] - csr_idx[:-1]
    seg = jnp.repeat(jnp.arange(num_segments), lengths, total_repeat_length=V)
    seg_max = jax.ops.segment_max(src, seg, num_segments=num_segments)
    # Empty-group guard: matches torch_scatter segment_csr('max') zero fill.
    seg_max = jnp.where(jnp.isfinite(seg_max), seg_max, 0.0)
    centered = src - seg_max[seg]
    if scaling:
        sqrt_len = jnp.sqrt(lengths.astype(src.dtype))
        centered = centered / sqrt_len[seg][:, None]
    e = jnp.exp(centered)
    denom = jax.ops.segment_sum(e, seg, num_segments=num_segments) + eps
    return e / denom[seg], seg_max, seg


def group_bimodal_csr_pool_forward(x_mod, comp, csr_idx, gate_w, gate_b, *,
                                   num_groups, group_scaling=True, gating=True,
                                   eps=1e-12, out_dtype=None):
    """GroupBimodalCSRPool.forward after the encoders: `comp` is the E_score
    output (V, num_groups), `x_mod` is the E_mod output (V, out_mod).
    The Gating step + final per-group scaling run fused in the Pallas kernel."""
    # TODO(synk): E_map (DeepSetFeat) / E_mod (MLP) / E_score encoders are not
    # defined in the provided spec; callers apply them and pass comp / x_mod.
    N = csr_idx.shape[0] - 1
    _, F = x_mod.shape
    attn, comp_max, seg = _segment_softmax_csr(comp, csr_idx, N, eps=eps,
                                               scaling=group_scaling)
    attn_exp = _expand_group_feat(attn, num_groups, F)
    # TODO(synk): the ragged CSR scatter reductions (segment sum/max over
    # variable-length groups) stay in XLA; a Pallas version needs a
    # scalar-prefetch ragged pipeline (csr offsets in SMEM) and is out of scope.
    x_pool = jax.ops.segment_sum(x_mod * attn_exp, seg, num_segments=N)
    if gating:
        x_pool = gated_pool_scale(x_pool, comp_max, gate_w, gate_b,
                                  num_groups=num_groups, out_dtype=out_dtype)
    return x_pool


def group_bimodal_csr_pool_reference(x_mod, comp, csr_idx, gate_w, gate_b, *,
                                     num_groups, group_scaling=True, eps=1e-12):
    """Pure-JAX reference (no Pallas)."""
    N = csr_idx.shape[0] - 1
    _, F = x_mod.shape
    attn, comp_max, seg = _segment_softmax_csr(comp, csr_idx, N, eps=eps,
                                               scaling=group_scaling)
    attn_exp = _expand_group_feat(attn, num_groups, F)
    x_pool = jax.ops.segment_sum(x_mod * attn_exp, seg, num_segments=N)
    gate = jnp.tanh(jnp.maximum(
        comp_max * gate_w.reshape(1, -1) + gate_b.reshape(1, -1), 0.0))
    return x_pool * _expand_group_feat(gate, num_groups, F)


if __name__ == "__main__":
    key = jax.random.PRNGKey(0)
    ks = jax.random.split(key, 8)

    # --- docstring-sized example (includes an empty CSR group) --------------
    Nseg, V, F_mod, G = 5, 20, 8, 2
    csr_idx = jnp.array([0, 4, 4, 5, 10, 20], dtype=jnp.int32)
    x_mod = jax.random.normal(ks[0], (V, F_mod), dtype=jnp.float32)   # E_mod out
    comp = jax.random.normal(ks[1], (V, G), dtype=jnp.float32)        # E_score out
    gw = jnp.ones((1, G), jnp.float32) + 0.1 * jax.random.normal(ks[2], (1, G))
    gb = 0.1 * jax.random.normal(ks[3], (1, G))

    out = jax.block_until_ready(group_bimodal_csr_pool_forward(
        x_mod, comp, csr_idx, gw, gb, num_groups=G, group_scaling=True))
    ref = group_bimodal_csr_pool_reference(
        x_mod, comp, csr_idx, gw, gb, num_groups=G, group_scaling=True)
    assert out.shape == (Nseg, F_mod)
    assert jnp.allclose(out, ref, atol=1e-5, rtol=1e-5)

    # --- larger case: multi-block ragged grid (3 blocks, ragged tail) -------
    Nseg2, F2, G2 = 300, 64, 4
    lens = jax.random.randint(ks[4], (Nseg2,), 0, 7)
    csr2 = jnp.concatenate([jnp.zeros((1,), jnp.int32),
                            jnp.cumsum(lens).astype(jnp.int32)])
    V2 = int(csr2[-1])
    x_mod2 = jax.random.normal(ks[5], (V2, F2), dtype=jnp.float32)
    comp2 = jax.random.normal(ks[6], (V2, G2), dtype=jnp.float32)
    gw2 = jnp.ones((1, G2), jnp.float32)
    gb2 = jnp.full((1, G2), 0.05, jnp.float32)
    out2 = jax.block_until_ready(group_bimodal_csr_pool_forward(
        x_mod2, comp2, csr2, gw2, gb2, num_groups=G2, group_scaling=True))
    ref2 = group_bimodal_csr_pool_reference(
        x_mod2, comp2, csr2, gw2, gb2, num_groups=G2, group_scaling=True)
    assert out2.shape == (Nseg2, F2)
    assert jnp.allclose(out2, ref2, atol=1e-4, rtol=1e-4)

    # --- fused kernel standalone: G == 1 (broadcast) and G == F (no expand) -
    xp = jax.random.normal(ks[7], (37, 16), dtype=jnp.float32)
    cm1 = jax.random.normal(ks[0], (37, 1), dtype=jnp.float32)
    o1 = jax.block_until_ready(gated_pool_scale(
        xp, cm1, jnp.ones((1, 1), jnp.float32), jnp.zeros((1, 1), jnp.float32),
        num_groups=1))
    r1 = xp * jnp.tanh(jnp.maximum(cm1, 0.0))
    assert jnp.allclose(o1, r1, atol=1e-6, rtol=1e-6)

    cmF = jax.random.normal(ks[1], (37, 16), dtype=jnp.float32)
    oF = jax.block_until_ready(gated_pool_scale(
        xp, cmF, jnp.ones((1, 16), jnp.float32), jnp.zeros((1, 16), jnp.float32),
        num_groups=16))
    rF = xp * jnp.tanh(jnp.maximum(cmF, 0.0))
    assert jnp.allclose(oF, rF, atol=1e-6, rtol=1e-6)

    # --- bf16 I/O variant (f32 math inside the kernel) ----------------------
    xpb = xp.astype(jnp.bfloat16)
    cmb = jax.random.normal(ks[2], (37, 4), dtype=jnp.float32)
    ob = jax.block_until_ready(gated_pool_scale(
        xpb, cmb, jnp.ones((1, 4), jnp.float32), jnp.zeros((1, 4), jnp.float32),
        num_groups=4, out_dtype=jnp.bfloat16))
    gate_b16 = jnp.tanh(jnp.maximum(cmb, 0.0))
    rb = xpb.astype(jnp.float32) * _expand_group_feat(gate_b16, 4, 16)
    assert ob.dtype == jnp.bfloat16
    assert jnp.allclose(ob.astype(jnp.float32), rb, atol=1e-2, rtol=1e-2)

    print("KERNEL_OK")
</pallas_src>

<mosaic_0001>
module attributes {stable_mosaic.version = 11 : i64} {
  func.func @kernel(%arg0: i32, %arg1: memref<5x8xf32, #tpu.memory_space<vmem>>, %arg2: memref<5x2xf32, #tpu.memory_space<vmem>>, %arg3: memref<1x2xf32, #tpu.memory_space<vmem>>, %arg4: memref<1x2xf32, #tpu.memory_space<vmem>>, %arg5: memref<2x8xf32, #tpu.memory_space<vmem>>, %arg6: memref<5x8xf32, #tpu.memory_space<vmem>>) attributes {dimension_semantics = [#tpu.dimension_semantics<parallel>], iteration_bounds = array<i64: 1>, scalar_prefetch = 0 : i64, scratch_operands = 0 : i64, tpu.core_type = #tpu.core_type<tc>, window_params = [{transform_indices = @transform_0, window_bounds = array<i64: 5, 8>}, {transform_indices = @transform_1, window_bounds = array<i64: 5, 2>}, {pipeline_mode = #tpu.pipeline_mode<synchronous>, transform_indices = @transform_2, window_bounds = array<i64: 1, 2>}, {pipeline_mode = #tpu.pipeline_mode<synchronous>, transform_indices = @transform_3, window_bounds = array<i64: 1, 2>}, {pipeline_mode = #tpu.pipeline_mode<synchronous>, transform_indices = @transform_4, window_bounds = array<i64: 2, 8>}, {transform_indices = @transform_5, window_bounds = array<i64: 5, 8>}]} {
    %c0 = arith.constant 0 : index
    %c0_0 = arith.constant 0 : index
    %0 = vector.load %arg2[%c0, %c0_0] : memref<5x2xf32, #tpu.memory_space<vmem>>, vector<5x2xf32>
    %c0_1 = arith.constant 0 : index
    %c0_2 = arith.constant 0 : index
    %1 = vector.load %arg3[%c0_1, %c0_2] : memref<1x2xf32, #tpu.memory_space<vmem>>, vector<1x2xf32>
    %c0_3 = arith.constant 0 : index
    %c0_4 = arith.constant 0 : index
    %2 = vector.load %arg4[%c0_3, %c0_4] : memref<1x2xf32, #tpu.memory_space<vmem>>, vector<1x2xf32>
    %3 = vector.broadcast %1 : vector<1x2xf32> to vector<5x2xf32>
    %4 = arith.mulf %0, %3 : vector<5x2xf32>
    %5 = vector.broadcast %2 : vector<1x2xf32> to vector<5x2xf32>
    %6 = arith.addf %4, %5 : vector<5x2xf32>
    %cst = arith.constant 0.000000e+00 : f32
    %7 = vector.broadcast %cst : f32 to vector<5x2xf32>
    %8 = arith.maximumf %6, %7 : vector<5x2xf32>
    %9 = math.tanh %8 : vector<5x2xf32>
    %c0_5 = arith.constant 0 : index
    %c0_6 = arith.constant 0 : index
    %10 = vector.load %arg5[%c0_5, %c0_6] : memref<2x8xf32, #tpu.memory_space<vmem>>, vector<2x8xf32>
    %cst_7 = arith.constant dense<0.000000e+00> : vector<5x8xf32>
    %11 = tpu.matmul %9, %10, %cst_7 {dimension_numbers = #tpu.dot_dimension_numbers<[1], [0], [0], [1], [0, 0, 1, 1], [], []>} : vector<5x2xf32>, vector<2x8xf32>, vector<5x8xf32> -> vector<5x8xf32>
    %c0_8 = arith.constant 0 : index
    %c0_9 = arith.constant 0 : index
    %12 = vector.load %arg1[%c0_8, %c0_9] : memref<5x8xf32, #tpu.memory_space<vmem>>, vector<5x8xf32>
    %13 = arith.mulf %12, %11 : vector<5x8xf32>
    %c0_10 = arith.constant 0 : index
    %c0_11 = arith.constant 0 : index
    %14 = vector.load %arg6[%c0_10, %c0_11] : memref<5x8xf32, #tpu.memory_space<vmem>>, vector<5x8xf32>
    tpu.vector_store %arg6[%c0_10, %c0_11], %13 {strides = array<i32>} : memref<5x8xf32, #tpu.memory_space<vmem>>, vector<5x8xf32>,
    return
  }
  func.func @transform_0(%arg0: i32) -> (i32, i32) {
    %c0_i32 = arith.constant 0 : i32
    %c0_i32_0 = arith.constant 0 : i32
    return %arg0, %c0_i32 : i32, i32
  }
  func.func @transform_1(%arg0: i32) -> (i32, i32) {
    %c0_i32 = arith.constant 0 : i32
    %c0_i32_0 = arith.constant 0 : i32
    return %arg0, %c0_i32 : i32, i32
  }
  func.func @transform_2(%arg0: i32) -> (i32, i32) {
    %c0_i32 = arith.constant 0 : i32
    %c0_i32_0 = arith.constant 0 : i32
    %c0_i32_1 = arith.constant 0 : i32
    return %c0_i32, %c0_i32_0 : i32, i32
  }
  func.func @transform_3(%arg0: i32) -> (i32, i32) {
    %c0_i32 = arith.constant 0 : i32
    %c0_i32_0 = arith.constant 0 : i32
    %c0_i32_1 = arith.constant 0 : i32
    return %c0_i32, %c0_i32_0 : i32, i32
  }
  func.func @transform_4(%arg0: i32) -> (i32, i32) {
    %c0_i32 = arith.constant 0 : i32
    %c0_i32_0 = arith.constant 0 : i32
    %c0_i32_1 = arith.constant 0 : i32
    return %c0_i32, %c0_i32_0 : i32, i32
  }
  func.func @transform_5(%arg0: i32) -> (i32, i32) {
    %c0_i32 = arith.constant 0 : i32
    %c0_i32_0 = arith.constant 0 : i32
    return %arg0, %c0_i32 : i32, i32
  }
}

</mosaic_0001>

<bundles_post_ra>
// kernel: tpu_custom_call.1
= control target key start
LH: loop header
LB: loop body
LE: loop exit
PB: predicated region body
PF: predicated region fallthrough
CT: control target
= control target key end

     0   :  { %vm39_vm0 = vcmask 1041408   ;;  %s165_s0 = inlined_call_operand.vmem [shape: f32[5,8], index: 0, kind: input, shape index: {}]   ;;  %s166_s1 = inlined_call_operand.vmem [shape: f32[5,2], index: 1, kind: input, shape index: {}]   ;;  %s167_s2 = inlined_call_operand.vmem [shape: f32[1,2], index: 2, kind: input, shape index: {}]   ;;  %s168_s3 = inlined_call_operand.vmem [shape: f32[1,2], index: 3, kind: input, shape index: {}]   ;;  %s169_s4 = inlined_call_operand.vmem [shape: f32[2,8], index: 4, kind: input, shape index: {}]   ;;  %s170_s5 = inlined_call_operand.hbm [shape: f32[5,8], index: 5, kind: output, shape index: {}]  }
   0x1   :  { %v34_v0 = vld [vmem:[%s169_s4] sm:$0x3] }
   0x2   :  { %v21_v1 = vld [vmem:[%s166_s1] sm:$0x1f]  ;;  %83 = vmatpush.msk.msra.mxu0 %vm39_vm0, %v34_v0 }
   0x3   :  { %v86_v2 = vld [vmem:[%s167_s2] ss:$0 sm:$0xff] }
   0x4   :  { %v87_v3 = vld [vmem:[%s168_s3] ss:$0 sm:$0xff] }
   0x5   :  { %10 = vsyncpa [#allocation3], 0  ;;  %v27_v4 = vmul.f32 %v86_v2, %v21_v1  ;;  %vm35_vm1 = vcmask 15360   ;;  %v63_v8 = vld [vmem:[%s165_s0] sm:$0x1f]  ;;  %s116_s1 = smov [#allocation2]  }
   0x6   :  { %s72_s27 = sshll.u32 %s116_s1, 4  ;;  %s74_s29 = sshll.u32 %s170_s5, 4  ;;  %vm65_vm2 = vcmask 61440   ;;  %s73_s27 = int_to_ptr.vmem [resolvable:$true] %s72_s27  ;;  %s75_s29 = int_to_ptr.hbm [resolvable:$true] %s74_s29 }
   0x7   :  { %v31_v5 = vadd.f32 %v87_v3, %v27_v4 }
   0x9   :  { %v32_v6 = vmax.f32 %v31_v5, 0.0 }
   0xb   :  { %88 = vtanh.f32 %v32_v6 }
  0x11   :  { %v89_v7 = vpop.eup %88 }
  0x12   :  { %84 = vmatmul.msk.f32.vlgmr.msra.gmra.mxu0 %vm35_vm1, %v89_v7 }
  0x8f   :  { %v60_v9 = vpop.f32.mrf.mxu0 }
  0x90   :  { %v64_v10 = vmul.f32 %v63_v8, %v60_v9 }
  0x92   :  { %66 = vst.msk [vmem:[#allocation2] sm:$0x1f] %vm65_vm2, %v64_v10 }
  0x93   :  { %77 = dma.vmem_to_hbm [thread:$0]  %s73_s27, 128, %s75_s29, [#allocation3]  }
  0x94   :  { %114 = dma.done.wait [#allocation3], 128  }
  0x95   :  { %115 = vsyncadd [#allocation3], 4294967168 }
  0x96   :  { %82 = vsyncpa [#allocation3], 1 }

</bundles_post_ra>
